<compile_context>
chip_gen: v7x
topology: tpu7x:2x2x1
jax: 0.10.0
libtpu: 0.0.40
codegen_flags: <defaults>
</compile_context>

<pallas_src>
import functools
import math

import jax
import jax.numpy as jnp
from jax.experimental import pallas as pl
from jax.experimental.pallas import tpu as pltpu

_INV_SQRT2 = 1.0 / math.sqrt(2.0)


def _round_up(a, m):
    return ((a + m - 1) // m) * m


def _gelu(h, approximate):
    if approximate:
        # tanh-form GELU: the transcendental goes to the EUP (its own VLIW slot) instead of a
        # long erf polynomial on the VALU. Use approximate=False for strict torch.nn.GELU parity.
        return jax.nn.gelu(h, approximate=True)
    return 0.5 * h * (1.0 + jax.lax.erf(h * _INV_SQRT2))


def _tpu_vmem_capacity_bytes():
    """Best-effort physical VMEM per core; falls back to generation defaults."""
    try:
        return int(pltpu.get_tpu_info().vmem_capacity_bytes)
    except Exception:
        kind = ""
        try:
            kind = jax.devices()[0].device_kind.lower()
        except Exception:
            pass
        return (64 if "v7" in kind else 128) * 2**20


# ----------------------------------------------------------------------------------------------
# Kernels
# ----------------------------------------------------------------------------------------------
def _ffn_kernel_resident(x_ref, w1_ref, b1_ref, w2_ref, b2_ref, o_ref, *, approximate):
    """Grid = (row_tiles,). Whole W1/W2 are resident in VMEM (constant block index)."""
    h = jnp.dot(x_ref[...], w1_ref[...], preferred_element_type=jnp.float32)
    h = h + b1_ref[...]                       # bias in f32
    # dropout_1: identity (inference).
    h = _gelu(h, approximate)
    acc = jnp.dot(h.astype(w2_ref.dtype), w2_ref[...], preferred_element_type=jnp.float32)
    acc = acc + b2_ref[...]
    # dropout_2: identity (inference).
    o_ref[...] = acc.astype(o_ref.dtype)


def _ffn_kernel_tiled(x_ref, w1_ref, b1_ref, w2_ref, b2_ref, o_ref, acc_ref, *, approximate):
    """Grid = (row_tiles, hidden_chunks); hidden axis is the inner reduction axis."""
    k = pl.program_id(1)

    # Initialize the f32 accumulator with the (already f32) second bias once per row tile.
    @pl.when(k == 0)
    def _():
        acc_ref[...] = jnp.broadcast_to(b2_ref[...], acc_ref.shape)

    # First linear (this hidden chunk): [tm, in_p](bf16) @ [in_p, th](bf16) -> f32
    h = jnp.dot(x_ref[...], w1_ref[...], preferred_element_type=jnp.float32)
    h = h + b1_ref[...]
    # dropout_1: identity (inference).
    h = _gelu(h, approximate)

    # Second linear, accumulated over hidden chunks: [tm, th](bf16) @ [th, dim_p](bf16) -> f32
    acc_ref[...] += jnp.dot(
        h.astype(w2_ref.dtype), w2_ref[...], preferred_element_type=jnp.float32
    )
    # dropout_2: identity (inference).

    @pl.when(k == pl.num_programs(1) - 1)
    def _():
        o_ref[...] = acc_ref[...].astype(o_ref.dtype)


# ----------------------------------------------------------------------------------------------
# Wrappers
# ----------------------------------------------------------------------------------------------
def prepare_ffn_params(w1, b1, w2, b2, *, compute_dtype=jnp.bfloat16, th=None,
                       force_path=None, vmem_cap=None):
    """Pad/cast the FFN parameters ONCE (hoisted out of the per-call forward path).

    w1: [input_dim, hidden], b1: [hidden], w2: [hidden, dim], b2: [dim] (x @ W layout).
    Returns (padded_params, meta).
    """
    input_dim, hidden_dim = w1.shape
    assert w2.shape[0] == hidden_dim
    dim = w2.shape[1]

    if vmem_cap is None:
        vmem_cap = _tpu_vmem_capacity_bytes()

    in_p = _round_up(input_dim, 128)
    hid_p = _round_up(hidden_dim, 128)
    dim_p = _round_up(dim, 128)

    bpe = jnp.dtype(compute_dtype).itemsize
    resident_bytes = (in_p * hid_p + hid_p * dim_p) * bpe + (hid_p + dim_p) * 4
    # Hold the weights resident in VMEM (DMA'd once for the whole kernel) when they use less
    # than ~40% of physical VMEM, leaving room for double-buffered x/out tiles, the f32
    # intermediate, and pipeline headroom.
    if force_path == "resident":
        weights_resident = True
    elif force_path == "tiled":
        weights_resident = False
    else:
        weights_resident = resident_bytes <= 0.4 * vmem_cap

    if weights_resident:
        th_eff = hid_p
    else:
        if th is None:
            # Bigger hidden chunks on generations with more VMEM -> fewer grid steps and fewer
            # read-modify-write passes over the f32 accumulator.
            th = 1024 if vmem_cap >= 96 * 2**20 else 512
        th_eff = max(128, _round_up(min(th, hid_p), 128))
        hid_p = _round_up(hidden_dim, th_eff)

    w1_p = (jnp.zeros((in_p, hid_p), compute_dtype)
            .at[:input_dim, :hidden_dim].set(w1.astype(compute_dtype)))
    b1_p = jnp.zeros((1, hid_p), jnp.float32).at[0, :hidden_dim].set(b1.astype(jnp.float32))
    w2_p = (jnp.zeros((hid_p, dim_p), compute_dtype)
            .at[:hidden_dim, :dim].set(w2.astype(compute_dtype)))
    b2_p = jnp.zeros((1, dim_p), jnp.float32).at[0, :dim].set(b2.astype(jnp.float32))

    meta = dict(
        input_dim=input_dim, hidden_dim=hidden_dim, dim=dim,
        in_p=in_p, hid_p=hid_p, dim_p=dim_p, th=th_eff,
        weights_resident=weights_resident, compute_dtype=compute_dtype, vmem_cap=vmem_cap,
    )
    return (w1_p, b1_p, w2_p, b2_p), meta


def feed_forward_padded(x, params, meta, *, tm=256, gelu_approximate=True):
    """Forward pass with pre-padded params. x: [N, input_dim]."""
    w1_p, b1_p, w2_p, b2_p = params
    N, input_dim = x.shape
    assert input_dim == meta["input_dim"]
    in_p, hid_p, dim_p, th = meta["in_p"], meta["hid_p"], meta["dim_p"], meta["th"]
    compute_dtype = meta["compute_dtype"]
    vmem_cap = meta["vmem_cap"]
    out_dtype = x.dtype
    bpe = jnp.dtype(compute_dtype).itemsize
    out_bpe = jnp.dtype(out_dtype).itemsize

    # Row tile: 256 fills the 256-wide MXU M dim on v6e/v7x and divides weight re-streaming on
    # v5e. Tiny inputs only pad rows to a sublane multiple (8), not to a full 256-row tile.
    tm = _round_up(min(tm, _round_up(N, 8)), 8)
    n_p = _round_up(N, tm)

    x_p = jnp.zeros((n_p, in_p), compute_dtype).at[:N, :input_dim].set(x.astype(compute_dtype))

    if meta["weights_resident"]:
        kernel = functools.partial(_ffn_kernel_resident, approximate=gelu_approximate)
        grid = (n_p // tm,)
        in_specs = [
            pl.BlockSpec((tm, in_p), lambda i: (i, 0)),        # x row tile
            pl.BlockSpec((in_p, hid_p), lambda i: (0, 0)),     # W1 (resident, DMA'd once)
            pl.BlockSpec((1, hid_p), lambda i: (0, 0)),        # b1
            pl.BlockSpec((hid_p, dim_p), lambda i: (0, 0)),    # W2 (resident)
            pl.BlockSpec((1, dim_p), lambda i: (0, 0)),        # b2
        ]
        out_specs = pl.BlockSpec((tm, dim_p), lambda i: (i, 0))   # lane-dense output
        scratch_shapes = []
        dims = ("parallel",)
        vmem_est = (
            2 * (tm * in_p * bpe + tm * dim_p * out_bpe)
            + 2 * ((in_p * hid_p + hid_p * dim_p) * bpe + (hid_p + dim_p) * 4)
            + tm * hid_p * 4  # f32 intermediate
        )
    else:
        kernel = functools.partial(_ffn_kernel_tiled, approximate=gelu_approximate)
        grid = (n_p // tm, hid_p // th)
        in_specs = [
            pl.BlockSpec((tm, in_p), lambda i, k: (i, 0)),     # x row tile (resident over k)
            pl.BlockSpec((in_p, th), lambda i, k: (0, k)),     # W1 hidden chunk
            pl.BlockSpec((1, th), lambda i, k: (0, k)),        # b1 hidden chunk
            pl.BlockSpec((th, dim_p), lambda i, k: (k, 0)),    # W2 hidden chunk
            pl.BlockSpec((1, dim_p), lambda i, k: (0, 0)),     # b2 (constant)
        ]
        out_specs = pl.BlockSpec((tm, dim_p), lambda i, k: (i, 0))   # lane-dense output
        scratch_shapes = [pltpu.VMEM((tm, dim_p), jnp.float32)]      # f32 accumulator
        dims = ("parallel", "arbitrary")
        vmem_est = (
            2 * (tm * in_p * bpe + in_p * th * bpe + th * 4 + th * dim_p * bpe
                 + dim_p * 4 + tm * dim_p * out_bpe)
            + tm * dim_p * 4 + tm * th * 4
        )
        # TODO(synk): for very large dim_p (esp. v7x), add a "parallel" output-column grid axis
        # to bound the accumulator/out tile and give both TensorCores a second axis to shard.

    # Generation-aware VMEM limit: never below the estimated need, ~15% headroom below the
    # physical per-core capacity (no fixed 64 MiB clamp).
    vmem_limit = int(min(max(int(1.25 * vmem_est), 32 * 2**20), int(0.85 * vmem_cap)))

    out_p = pl.pallas_call(
        kernel,
        out_shape=jax.ShapeDtypeStruct((n_p, dim_p), out_dtype),
        grid_spec=pltpu.PrefetchScalarGridSpec(
            num_scalar_prefetch=0,
            grid=grid,
            in_specs=in_specs,
            out_specs=out_specs,
            scratch_shapes=scratch_shapes,
        ),
        compiler_params=pltpu.CompilerParams(
            dimension_semantics=dims,
            vmem_limit_bytes=vmem_limit,
        ),
    )(x_p, w1_p, b1_p, w2_p, b2_p)

    # Slice away row / lane padding.
    return out_p[:N, : meta["dim"]]


def feed_forward(x, w1, b1, w2, b2, *, tm=256, gelu_approximate=True,
                 compute_dtype=jnp.bfloat16):
    """One-shot convenience wrapper. For repeated calls, run prepare_ffn_params() once."""
    params, meta = prepare_ffn_params(w1, b1, w2, b2, compute_dtype=compute_dtype)
    return feed_forward_padded(x, params, meta, tm=tm, gelu_approximate=gelu_approximate)


# ----------------------------------------------------------------------------------------------
# Demo / self-test
# ----------------------------------------------------------------------------------------------
def _torch_linear_init(key, in_features, out_features):
    """Deterministic init mimicking torch.nn.Linear.reset_parameters (uniform +/-1/sqrt(in))."""
    kw, kb = jax.random.split(key)
    bound = 1.0 / math.sqrt(in_features)
    w = jax.random.uniform(kw, (in_features, out_features), jnp.float32, -bound, bound)
    b = jax.random.uniform(kb, (out_features,), jnp.float32, -bound, bound)
    return w, b


def _reference(x, w1, b1, w2, b2, approximate):
    """Pure-JAX reference mirroring the kernel's bf16 rounding of MXU operands."""
    xb = x.astype(jnp.bfloat16).astype(jnp.float32)
    w1b = w1.astype(jnp.bfloat16).astype(jnp.float32)
    w2b = w2.astype(jnp.bfloat16).astype(jnp.float32)
    h = xb @ w1b + b1
    h = _gelu(h, approximate)
    h = h.astype(jnp.bfloat16).astype(jnp.float32)
    return h @ w2b + b2


if __name__ == "__main__":
    key = jax.random.PRNGKey(0)
    k0, kx, k1, k2 = jax.random.split(key, 4)

    # --- Config 1: module defaults (dim=32, hidden_dim_multiplier=2, dropout=0.1,
    #     input_dim_multiplier=1), N=16 nodes -> weights-resident path, 1-D grid.
    dim, hidden_mult, input_mult = 32, 2, 1
    input_dim, hidden_dim = int(dim * input_mult), int(dim * hidden_mult)
    N = 16
    x = jax.random.normal(kx, (N, input_dim), jnp.float32)
    w1, b1 = _torch_linear_init(k1, input_dim, hidden_dim)
    w2, b2 = _torch_linear_init(k2, hidden_dim, dim)

    params, meta = prepare_ffn_params(w1, b1, w2, b2)       # hoisted out of the forward path
    out = jax.block_until_ready(feed_forward_padded(x, params, meta))
    ref = _reference(x, w1, b1, w2, b2, approximate=True)
    assert out.shape == (N, dim)
    assert meta["weights_resident"]
    assert jnp.allclose(out, ref, atol=2e-2, rtol=2e-2), "resident-path mismatch vs reference"

    # --- Config 2: force the hidden-tiled accumulator path (dim=64, hidden=512, input=128).
    dim2, hidden_mult2, input_mult2 = 64, 8, 2
    input_dim2, hidden_dim2 = int(dim2 * input_mult2), int(dim2 * hidden_mult2)
    N2 = 40
    kx2, k12, k22 = jax.random.split(k0, 3)
    x2 = jax.random.normal(kx2, (N2, input_dim2), jnp.float32)
    w1_2, b1_2 = _torch_linear_init(k12, input_dim2, hidden_dim2)
    w2_2, b2_2 = _torch_linear_init(k22, hidden_dim2, dim2)

    params2, meta2 = prepare_ffn_params(w1_2, b1_2, w2_2, b2_2, force_path="tiled", th=256)
    out2 = jax.block_until_ready(feed_forward_padded(x2, params2, meta2))
    ref2 = _reference(x2, w1_2, b1_2, w2_2, b2_2, approximate=True)
    assert out2.shape == (N2, dim2)
    assert not meta2["weights_resident"]
    assert jnp.allclose(out2, ref2, atol=2e-2, rtol=2e-2), "tiled-path mismatch vs reference"

    print("KERNEL_OK")
</pallas_src>

<mosaic_0001>
module attributes {stable_mosaic.version = 11 : i64} {
  func.func @_ffn_kernel_resident(%arg0: i32, %arg1: memref<16x128xbf16, #tpu.memory_space<vmem>>, %arg2: memref<128x128xbf16, #tpu.memory_space<vmem>>, %arg3: memref<1x128xf32, #tpu.memory_space<vmem>>, %arg4: memref<128x128xbf16, #tpu.memory_space<vmem>>, %arg5: memref<1x128xf32, #tpu.memory_space<vmem>>, %arg6: memref<16x128xf32, #tpu.memory_space<vmem>>) attributes {dimension_semantics = [#tpu.dimension_semantics<parallel>], iteration_bounds = array<i64: 1>, scalar_prefetch = 0 : i64, scratch_operands = 0 : i64, tpu.core_type = #tpu.core_type<tc>, window_params = [{transform_indices = @transform_0, window_bounds = array<i64: 16, 128>}, {pipeline_mode = #tpu.pipeline_mode<synchronous>, transform_indices = @transform_1, window_bounds = array<i64: 128, 128>}, {pipeline_mode = #tpu.pipeline_mode<synchronous>, transform_indices = @transform_2, window_bounds = array<i64: 1, 128>}, {pipeline_mode = #tpu.pipeline_mode<synchronous>, transform_indices = @transform_3, window_bounds = array<i64: 128, 128>}, {pipeline_mode = #tpu.pipeline_mode<synchronous>, transform_indices = @transform_4, window_bounds = array<i64: 1, 128>}, {transform_indices = @transform_5, window_bounds = array<i64: 16, 128>}]} {
    %c0 = arith.constant 0 : index
    %c0_0 = arith.constant 0 : index
    %0 = vector.load %arg1[%c0, %c0_0] : memref<16x128xbf16, #tpu.memory_space<vmem>>, vector<16x128xbf16>
    %c0_1 = arith.constant 0 : index
    %c0_2 = arith.constant 0 : index
    %1 = vector.load %arg2[%c0_1, %c0_2] : memref<128x128xbf16, #tpu.memory_space<vmem>>, vector<128x128xbf16>
    %cst = arith.constant dense<0.000000e+00> : vector<16x128xf32>
    %2 = tpu.matmul %0, %1, %cst {dimension_numbers = #tpu.dot_dimension_numbers<[1], [0], [0], [1], [0, 0, 1, 1], [], []>} : vector<16x128xbf16>, vector<128x128xbf16>, vector<16x128xf32> -> vector<16x128xf32>
    %c0_3 = arith.constant 0 : index
    %c0_4 = arith.constant 0 : index
    %3 = vector.load %arg3[%c0_3, %c0_4] : memref<1x128xf32, #tpu.memory_space<vmem>>, vector<1x128xf32>
    %4 = vector.broadcast %3 : vector<1x128xf32> to vector<16x128xf32>
    %5 = arith.addf %2, %4 : vector<16x128xf32>
    %6 = arith.mulf %5, %5 : vector<16x128xf32>
    %7 = arith.mulf %5, %6 : vector<16x128xf32>
    %cst_5 = arith.constant 4.471500e-02 : f32
    %8 = vector.broadcast %cst_5 : f32 to vector<16x128xf32>
    %9 = arith.mulf %8, %7 : vector<16x128xf32>
    %10 = arith.addf %5, %9 : vector<16x128xf32>
    %cst_6 = arith.constant 0.797884583 : f32
    %11 = vector.broadcast %cst_6 : f32 to vector<16x128xf32>
    %12 = arith.mulf %11, %10 : vector<16x128xf32>
    %13 = math.tanh %12 : vector<16x128xf32>
    %cst_7 = arith.constant 1.000000e+00 : f32
    %14 = vector.broadcast %cst_7 : f32 to vector<16x128xf32>
    %15 = arith.addf %14, %13 : vector<16x128xf32>
    %cst_8 = arith.constant 5.000000e-01 : f32
    %16 = vector.broadcast %cst_8 : f32 to vector<16x128xf32>
    %17 = arith.mulf %16, %15 : vector<16x128xf32>
    %18 = arith.mulf %5, %17 : vector<16x128xf32>
    %19 = arith.truncf %18 : vector<16x128xf32> to vector<16x128xbf16>
    %c0_9 = arith.constant 0 : index
    %c0_10 = arith.constant 0 : index
    %20 = vector.load %arg4[%c0_9, %c0_10] : memref<128x128xbf16, #tpu.memory_space<vmem>>, vector<128x128xbf16>
    %cst_11 = arith.constant dense<0.000000e+00> : vector<16x128xf32>
    %21 = tpu.matmul %19, %20, %cst_11 {dimension_numbers = #tpu.dot_dimension_numbers<[1], [0], [0], [1], [0, 0, 1, 1], [], []>} : vector<16x128xbf16>, vector<128x128xbf16>, vector<16x128xf32> -> vector<16x128xf32>
    %c0_12 = arith.constant 0 : index
    %c0_13 = arith.constant 0 : index
    %22 = vector.load %arg5[%c0_12, %c0_13] : memref<1x128xf32, #tpu.memory_space<vmem>>, vector<1x128xf32>
    %23 = vector.broadcast %22 : vector<1x128xf32> to vector<16x128xf32>
    %24 = arith.addf %21, %23 : vector<16x128xf32>
    %c0_14 = arith.constant 0 : index
    %c0_15 = arith.constant 0 : index
    %25 = vector.load %arg6[%c0_14, %c0_15] : memref<16x128xf32, #tpu.memory_space<vmem>>, vector<16x128xf32>
    tpu.vector_store %arg6[%c0_14, %c0_15], %24 {strides = array<i32>} : memref<16x128xf32, #tpu.memory_space<vmem>>, vector<16x128xf32>,
    return
  }
  func.func @transform_0(%arg0: i32) -> (i32, i32) {
    %c0_i32 = arith.constant 0 : i32
    %c0_i32_0 = arith.constant 0 : i32
    return %arg0, %c0_i32 : i32, i32
  }
  func.func @transform_1(%arg0: i32) -> (i32, i32) {
    %c0_i32 = arith.constant 0 : i32
    %c0_i32_0 = arith.constant 0 : i32
    %c0_i32_1 = arith.constant 0 : i32
    return %c0_i32, %c0_i32_0 : i32, i32
  }
  func.func @transform_2(%arg0: i32) -> (i32, i32) {
    %c0_i32 = arith.constant 0 : i32
    %c0_i32_0 = arith.constant 0 : i32
    %c0_i32_1 = arith.constant 0 : i32
    return %c0_i32, %c0_i32_0 : i32, i32
  }
  func.func @transform_3(%arg0: i32) -> (i32, i32) {
    %c0_i32 = arith.constant 0 : i32
    %c0_i32_0 = arith.constant 0 : i32
    %c0_i32_1 = arith.constant 0 : i32
    return %c0_i32, %c0_i32_0 : i32, i32
  }
  func.func @transform_4(%arg0: i32) -> (i32, i32) {
    %c0_i32 = arith.constant 0 : i32
    %c0_i32_0 = arith.constant 0 : i32
    %c0_i32_1 = arith.constant 0 : i32
    return %c0_i32, %c0_i32_0 : i32, i32
  }
  func.func @transform_5(%arg0: i32) -> (i32, i32) {
    %c0_i32 = arith.constant 0 : i32
    %c0_i32_0 = arith.constant 0 : i32
    return %arg0, %c0_i32 : i32, i32
  }
}

</mosaic_0001>

<bundles_post_ra>
// kernel: tpu_custom_call.1
= control target key start
LH: loop header
LB: loop body
LE: loop exit
PB: predicated region body
PF: predicated region fallthrough
CT: control target
= control target key end

     0   :  { %10 = vsyncpa [#allocation3], 0  ;;  %s646_s0 = inlined_call_operand.hbm [shape: bf16[16,128], index: 0, kind: input, shape index: {}]   ;;  %s647_s1 = inlined_call_operand.hbm [shape: bf16[128,128], index: 1, kind: input, shape index: {}]   ;;  %s648_s2 = inlined_call_operand.vmem [shape: f32[1,128], index: 2, kind: input, shape index: {}]   ;;  %s649_s3 = inlined_call_operand.hbm [shape: bf16[128,128], index: 3, kind: input, shape index: {}]   ;;  %s650_s4 = inlined_call_operand.vmem [shape: f32[1,128], index: 4, kind: input, shape index: {}]   ;;  %s651_s5 = inlined_call_operand.hbm [shape: f32[16,128], index: 5, kind: output, shape index: {}]  }
   0x1   :  { %11 = vsyncpa [#allocation6], 0 }
   0x2   :  { %12 = vsyncpa [#allocation4], 0  ;;  %s536_s18 = smov [#allocation5]   ;;  %s537_s20 = smov [#allocation2]  }
   0x3   :  { %s30_s19 = sshll.u32 %s536_s18, 4  ;;  %s18_s21 = sshll.u32 %s537_s20, 4  ;;  %s31_s19 = int_to_ptr.vmem [resolvable:$true] %s30_s19  ;;  %s576_s21 = int_to_ptr.vmem [resolvable:$true] %s18_s21 }
   0x4   :  { %s442_s24 = scalar_lea.hbm %s647_s1, 1024 }
   0x5   :  { %p443_p0 = scmp.ne.s32.totalorder %s647_s1, %s442_s24  ;;  %p446_p1 = scmp.lt.u32.totalorder %s442_s24, %s647_s1 }
   0x7   :  { %p448_p2 = pnand %p446_p1, %p443_p0 }
   0x9   :  { %451 = shalt.err (!%p448_p2)
}
   0xa   :  { %s452_s29 = scalar_lea.vmem %s31_s19, 1024  ;;  %p457_p4 = scmp.lt.s32.totalorder %s31_s19, %s31_s19 }
   0xb   :  { %p453_p3 = scmp.ne.s32.totalorder %s31_s19, %s452_s29  ;;  %p458_p5 = scmp.lt.s32.totalorder %s452_s29, %s452_s29 }
   0xd   :  { %p459_p6 = por %p458_p5, %p457_p4 }
   0xf   :  { %p460_p7 = pnand %p459_p6, %p453_p3 }
  0x11   :  { %463 = shalt.err (!%p460_p7)
}
  0x12   :  { %s538_s30 = smov 64   ;;  %s539_s6 = smov 4  }
  0x13   :  { %36 = dma.hbm_to_vmem [thread:$0]  %s647_s1, 1024, %s31_s19, [#allocation6], %s538_s30, %s538_s30, %s539_s6  }
  0x14   :  { %s464_s11 = scalar_lea.hbm %s646_s0, 128 }
  0x15   :  { %p465_p8 = scmp.ne.s32.totalorder %s646_s0, %s464_s11  ;;  %p468_p9 = scmp.lt.u32.totalorder %s464_s11, %s646_s0 }
  0x17   :  { %p470_p10 = pnand %p468_p9, %p465_p8 }
  0x19   :  { %473 = shalt.err (!%p470_p10)
}
  0x1a   :  { %s474_s16 = scalar_lea.vmem %s576_s21, 128  ;;  %p479_p12 = scmp.lt.s32.totalorder %s576_s21, %s576_s21 }
  0x1b   :  { %p475_p11 = scmp.ne.s32.totalorder %s576_s21, %s474_s16  ;;  %p480_p13 = scmp.lt.s32.totalorder %s474_s16, %s474_s16 }
  0x1d   :  { %p481_p0 = por %p480_p13, %p479_p12 }
  0x1f   :  { %p482_p1 = pnand %p481_p0, %p475_p11 }
  0x21   :  { %485 = shalt.err (!%p482_p1)
}
  0x22   :  { %24 = dma.hbm_to_vmem [thread:$0]  %s646_s0, 128, %s576_s21, [#allocation3], %s538_s30, %s538_s30, %s539_s6  }
  0x23   :  { %s540_s18 = smov [#allocation7]   ;;  %s486_s23 = scalar_lea.hbm %s649_s3, 1024 }
  0x24   :  { %s44_s19 = sshll.u32 %s540_s18, 4  ;;  %p487_p2 = scmp.ne.s32.totalorder %s649_s3, %s486_s23  ;;  %s45_s19 = int_to_ptr.vmem [resolvable:$true] %s44_s19 }
  0x25   :  { %p490_p3 = scmp.lt.u32.totalorder %s486_s23, %s649_s3 }
  0x27   :  { %p492_p4 = pnand %p490_p3, %p487_p2 }
  0x29   :  { %495 = shalt.err (!%p492_p4)
}
  0x2a   :  { %s496_s28 = scalar_lea.vmem %s45_s19, 1024  ;;  %p501_p6 = scmp.lt.s32.totalorder %s45_s19, %s45_s19 }
  0x2b   :  { %p497_p5 = scmp.ne.s32.totalorder %s45_s19, %s496_s28  ;;  %p502_p7 = scmp.lt.s32.totalorder %s496_s28, %s496_s28 }
  0x2d   :  { %p503_p8 = por %p502_p7, %p501_p6 }
  0x2f   :  { %p504_p9 = pnand %p503_p8, %p497_p5 }
  0x31   :  { %507 = shalt.err (!%p504_p9)
}
  0x32   :  { %50 = dma.hbm_to_vmem [thread:$0]  %s649_s3, 1024, %s45_s19, [#allocation6], %s538_s30, %s538_s30, %s539_s6  }
  0x33   :  { %530 = dma.done.wait [#allocation3], 128  }
  0x34   :  { %531 = vsyncadd [#allocation3], 4294967168 }
  0x35   :  { %532 = dma.done.wait [#allocation6], 2048  }
  0x36   :  { %533 = vsyncadd [#allocation6], 4294965248  ;;  %v541_v0 = vmov 0.0   ;;  %vm542_vm0 = vmmov 0   ;;  %v421_v1 = vld [vmem:[#allocation5] sm:$0xff]   ;;  %v422_v2 = vld [vmem:[#allocation5 + $0x8] sm:$0xff]  }
  0x37   :  { %371 = vmatprep.subr.bf16.mxu0 %v541_v0  ;;  %387 = vmatprep.mubr.msk.bf16.mxu0 %vm542_vm0, %v541_v0  ;;  %v423_v3 = vld [vmem:[#allocation5 + $0x10] sm:$0xff]   ;;  %v424_v4 = vld [vmem:[#allocation5 + $0x18] sm:$0xff]   ;;  %v425_v5 = vld [vmem:[#allocation5 + $0x20] sm:$0xff]   ;;  %s543_s6 = smov [#allocation8]  }
  0x38   :  { %391 = vmatprep.subr.bf16.mxu1 %v541_v0  ;;  %407 = vmatprep.mubr.msk.bf16.mxu1 %vm542_vm0, %v541_v0  ;;  %v426_v6 = vld [vmem:[#allocation5 + $0x28] sm:$0xff]   ;;  %v427_v7 = vld [vmem:[#allocation5 + $0x30] sm:$0xff]   ;;  %v428_v8 = vld [vmem:[#allocation5 + $0x38] sm:$0xff]   ;;  %s321_s7 = sshll.u32 %s543_s6, 4  ;;  %s322_s7 = int_to_ptr.vmem [resolvable:$true] %s321_s7 }
  0x39   :  { %372 = vmatpush3.bf16.msra.mxu0 %v421_v1  ;;  %v429_v9 = vld [vmem:[#allocation2] sm:$0xff]   ;;  %v430_v10 = vld [vmem:[#allocation7] sm:$0xff]   ;;  %v431_v11 = vld [vmem:[#allocation7 + $0x8] sm:$0xff]   ;;  %s508_s8 = scalar_lea.vmem %s322_s7, 256  ;;  %p513_p11 = scmp.lt.s32.totalorder %s322_s7, %s322_s7 }
  0x3a   :  { %373 = vmatprep.subr.bf16.mxu0 %v541_v0  ;;  %392 = vmatpush3.bf16.msra.mxu1 %v430_v10  ;;  %v432_v12 = vld [vmem:[#allocation7 + $0x10] sm:$0xff]   ;;  %v433_v13 = vld [vmem:[#allocation7 + $0x18] sm:$0xff]   ;;  %v434_v14 = vld [vmem:[#allocation7 + $0x20] sm:$0xff]   ;;  %p509_p10 = scmp.ne.s32.totalorder %s322_s7, %s508_s8  ;;  %p514_p12 = scmp.lt.s32.totalorder %s508_s8, %s508_s8 }
  0x3b   :  { %393 = vmatprep.subr.bf16.mxu1 %v541_v0  ;;  %v435_v15 = vld [vmem:[#allocation7 + $0x28] sm:$0xff]   ;;  %v436_v16 = vld [vmem:[#allocation7 + $0x30] sm:$0xff]   ;;  %v437_v17 = vld [vmem:[#allocation7 + $0x38] sm:$0xff]  }
  0x3c   :  { %v334_v18 = vld [vmem:[%s648_s2] ss:$0 sm:$0xff]  ;;  %p515_p13 = por %p514_p12, %p513_p11 }
  0x3d   :  { %374 = vmatpush3.bf16.msra.mxu0 %v422_v2  ;;  %v344_v44 = vld [vmem:[%s650_s4] ss:$0 sm:$0xff] }
  0x3e   :  { %375 = vmatprep.subr.bf16.mxu0 %v541_v0  ;;  %394 = vmatpush3.bf16.msra.mxu1 %v431_v11  ;;  %p516_p0 = pnand %p515_p13, %p509_p10 }
  0x3f   :  { %395 = vmatprep.subr.bf16.mxu1 %v541_v0 }
  0x41   :  { %376 = vmatpush3.bf16.msra.mxu0 %v423_v3 }
  0x42   :  { %377 = vmatprep.subr.bf16.mxu0 %v541_v0  ;;  %396 = vmatpush3.bf16.msra.mxu1 %v432_v12 }
  0x43   :  { %397 = vmatprep.subr.bf16.mxu1 %v541_v0 }
  0x45   :  { %378 = vmatpush3.bf16.msra.mxu0 %v424_v4 }
  0x46   :  { %379 = vmatprep.subr.bf16.mxu0 %v541_v0  ;;  %398 = vmatpush3.bf16.msra.mxu1 %v433_v13 }
  0x47   :  { %399 = vmatprep.subr.bf16.mxu1 %v541_v0 }
  0x49   :  { %380 = vmatpush3.bf16.msra.mxu0 %v425_v5 }
  0x4a   :  { %381 = vmatprep.subr.bf16.mxu0 %v541_v0  ;;  %400 = vmatpush3.bf16.msra.mxu1 %v434_v14 }
  0x4b   :  { %401 = vmatprep.subr.bf16.mxu1 %v541_v0 }
  0x4d   :  { %382 = vmatpush3.bf16.msra.mxu0 %v426_v6 }
  0x4e   :  { %383 = vmatprep.subr.bf16.mxu0 %v541_v0  ;;  %402 = vmatpush3.bf16.msra.mxu1 %v435_v15 }
  0x4f   :  { %403 = vmatprep.subr.bf16.mxu1 %v541_v0 }
  0x51   :  { %384 = vmatpush3.bf16.msra.mxu0 %v427_v7 }
  0x52   :  { %385 = vmatprep.subr.bf16.mxu0 %v541_v0  ;;  %404 = vmatpush3.bf16.msra.mxu1 %v436_v16 }
  0x53   :  { %405 = vmatprep.subr.bf16.mxu1 %v541_v0 }
  0x55   :  { %386 = vmatpush3.bf16.msra.mxu0 %v428_v8 }
  0x56   :  { %406 = vmatpush3.bf16.msra.mxu1 %v437_v17 }
  0x58   :  { %388 = vmatmul.mubr.bf16.vlgmr.msra.gmra.mrb[0].mxu0 %v429_v9 }
 0x12b   :  { %v176_v19 = vpop.f32.mrb[0].mxu0 }
 0x12c   :  { %v177_v20 = vadd.f32 %v334_v18, %v176_v19  ;;  %v389_v21 = vpop.f32.mrb[1].mxu0 }
 0x12d   :  { %v179_v22 = vpop.f32.mrb[2].mxu0 }
 0x12e   :  { %v183_v23 = vmul.f32 %v177_v20, %v177_v20  ;;  %v180_v24 = vadd.f32 %v334_v18, %v179_v22  ;;  %v390_v25 = vpop.f32.mrb[3].mxu0 }
 0x130   :  { %v185_v26 = vmul.f32 %v183_v23, %v177_v20  ;;  %v184_v27 = vmul.f32 %v180_v24, %v180_v24 }
 0x132   :  { %v187_v28 = vmul.f32 0.044715, %v185_v26  ;;  %v186_v29 = vmul.f32 %v184_v27, %v180_v24 }
 0x134   :  { %v189_v30 = vadd.f32 %v187_v28, %v177_v20  ;;  %v188_v31 = vmul.f32 0.044715, %v186_v29 }
 0x136   :  { %v191_v32 = vmul.f32 0.7978846, %v189_v30  ;;  %v190_v33 = vadd.f32 %v188_v31, %v180_v24 }
 0x138   :  { %438 = vtanh.f32 %v191_v32  ;;  %v192_v34 = vmul.f32 0.7978846, %v190_v33 }
 0x13a   :  { %440 = vtanh.f32 %v192_v34 }
 0x142   :  { %v439_v35 = vpop.eup %438 }
 0x143   :  { %v195_v36 = vadd.f32 1.0, %v439_v35 }
 0x144   :  { %v441_v37 = vpop.eup %440 }
 0x145   :  { %v196_v38 = vadd.f32 1.0, %v441_v37  ;;  %v197_v39 = vmul.f32 0.5, %v195_v36 }
 0x147   :  { %v198_v40 = vmul.f32 0.5, %v196_v38  ;;  %v199_v41 = vmul.f32 %v197_v39, %v177_v20 }
 0x149   :  { %v200_v42 = vmul.f32 %v198_v40, %v180_v24 }
 0x14b   :  { %v201_v43 = vpack.c.bf16 %v200_v42, %v199_v41 }
 0x14d   :  { %408 = vmatmul.mubr.bf16.vlgmr.msra.gmra.mrb[0].mxu1 %v201_v43 }
 0x220   :  { %v307_v45 = vpop.f32.mrb[0].mxu1 }
 0x221   :  { %v308_v46 = vadd.f32 %v344_v44, %v307_v45  ;;  %v409_v47 = vpop.f32.mrb[1].mxu1 }
 0x222   :  { %v310_v48 = vpop.f32.mrb[2].mxu1 }
 0x223   :  { %314 = vst [vmem:[#allocation8] sm:$0xff] %v308_v46  ;;  %v311_v49 = vadd.f32 %v344_v44, %v310_v48  ;;  %v410_v50 = vpop.f32.mrb[3].mxu1 }
 0x225   :  { %315 = vst [vmem:[#allocation8 + $0x8] sm:$0xff] %v311_v49 }
 0x226   :  { %519 = shalt.err (!%p516_p0)
}
 0x227   :  { %s520_s10 = scalar_lea.hbm %s651_s5, 256 }
 0x228   :  { %p521_p1 = scmp.ne.s32.totalorder %s651_s5, %s520_s10  ;;  %p524_p2 = scmp.lt.u32.totalorder %s520_s10, %s651_s5 }
 0x22a   :  { %p526_p3 = pnand %p524_p2, %p521_p1 }
 0x22c   :  { %529 = shalt.err (!%p526_p3)
}
 0x22d   :  { %s544_s15 = smov 128   ;;  %s545_s16 = smov 8  }
 0x22e   :  { %327 = dma.vmem_to_hbm [thread:$0]  %s322_s7, 256, %s651_s5, [#allocation4], %s544_s15, %s544_s15, %s545_s16  }
 0x22f   :  { %534 = dma.done.wait [#allocation4], 256  }
 0x230   :  { %535 = vsyncadd [#allocation4], 4294967040 }
 0x231   :  { %331 = vsyncpa [#allocation3], 1 }
 0x232   :  { %332 = vsyncpa [#allocation6], 1 }
 0x233   :  { %333 = vsyncpa [#allocation4], 1 }

</bundles_post_ra>
